<compile_context>
chip_gen: v7x
topology: tpu7x:2x2x1
jax: 0.10.0
libtpu: 0.0.40
codegen_flags: <defaults>
</compile_context>

<pallas_src>
import jax
import jax.numpy as jnp
from jax.experimental import pallas as pl
from jax.experimental.pallas import tpu as pltpu


# ----------------------------------------------------------------------------
# Small layout helpers.
# ----------------------------------------------------------------------------
def _round_up(x, m):
    return ((x + m - 1) // m) * m


def _choose_tiles(num_nodes):
    """Adjacency tile sizes and padded node counts.

    Rows (output nodes) tiled by tm (sublane dim, multiple of 8);
    columns (source nodes / reduction axis) tiled by tk (lane dim,
    multiple of 128).
    """
    tm = min(256, _round_up(num_nodes, 8))
    n_pad_rows = _round_up(num_nodes, tm)
    tk = min(512, _round_up(num_nodes, 128))
    n_pad_cols = _round_up(num_nodes, tk)
    return tm, tk, n_pad_rows, n_pad_cols


def _vmem_limit_bytes(tm, tk, c_pad, h_pad):
    """Rough double-buffered VMEM footprint, with 2x headroom, clamped to
    [16 MiB, 64 MiB] (v7x physical VMEM is 64 MiB)."""
    h4 = 4 * h_pad
    need = 0
    need += 2 * tm * tk * 2          # A tiles (bf16, double buffered)
    need += 2 * tk * c_pad * 2       # [x, h] tiles (bf16)
    need += 2 * c_pad * h4 * 2       # resident W^T (bf16)
    need += 2 * h4 * 4               # bias (f32)
    need += 2 * tm * h_pad * 4       # c_t tiles (f32)
    need += 2 * 2 * tm * h_pad * 4   # h_next / c_next tiles (f32)
    need += tm * c_pad * 4           # f32 accumulator scratch
    return int(min(64 * 1024 * 1024, max(16 * 1024 * 1024, 2 * need)))


# ----------------------------------------------------------------------------
# Pallas kernel: streamed (A @ [x,h]) accumulation + weight matmul + LSTM gates
# ----------------------------------------------------------------------------
def _gconv_lstm_kernel(a_ref,        # [tm, tk]          bf16  adjacency tile
                       xh_ref,       # [tk, C_pad]       bf16  [x, h_t] row tile
                       wt_ref,       # [C_pad, 4*H_pad]  bf16  packed W^T
                       bias_ref,     # [1, 4*H_pad]      f32
                       c_t_ref,      # [tm, H_pad]       f32
                       h_next_ref,   # [tm, H_pad]       f32   (out)
                       c_next_ref,   # [tm, H_pad]       f32   (out)
                       acc_ref):     # [tm, C_pad]       f32   scratch
    k = pl.program_id(1)

    @pl.when(k == 0)
    def _init():
        acc_ref[...] = jnp.zeros_like(acc_ref)

    # Reassociated matmul: stream the big N x N contraction at width C_pad
    # (= Cin+H padded), bf16 on the MXU, f32 accumulation.
    acc_ref[...] += jnp.dot(a_ref[...], xh_ref[...],
                            preferred_element_type=jnp.float32)

    @pl.when(k == pl.num_programs(1) - 1)
    def _finalize():
        h_pad = h_next_ref.shape[1]

        # Second (small) matmul: (A @ [x,h]) @ W^T + b.
        agg = jnp.dot(acc_ref[...].astype(jnp.bfloat16), wt_ref[...],
                      preferred_element_type=jnp.float32)
        agg = agg + bias_ref[...]

        # Gate order i, f, o, g (matches torch.split).  Fused activations
        # over contiguous, lane-aligned gate blocks.
        ifo = jax.nn.sigmoid(agg[:, : 3 * h_pad])
        g = jnp.tanh(agg[:, 3 * h_pad:])
        i = ifo[:, 0 * h_pad: 1 * h_pad]
        f = ifo[:, 1 * h_pad: 2 * h_pad]
        o = ifo[:, 2 * h_pad: 3 * h_pad]

        c_next = f * c_t_ref[...] + i * g
        h_next_ref[...] = o * jnp.tanh(c_next)
        c_next_ref[...] = c_next


# ----------------------------------------------------------------------------
# Per-graph precompute (hoist out of the per-timestep path).
# ----------------------------------------------------------------------------
def gcn_norm_dense(edge_index, edge_attr, num_nodes,
                   n_pad_rows=None, n_pad_cols=None):
    """Dense symmetrically-normalized adjacency, PyG GCNConv convention
    (add_self_loops=True, improved=False).  A[dst, src] scales x[src]'s
    contribution to node dst.  Returned zero-padded to
    [n_pad_rows, n_pad_cols] in bf16 (MXU-native).  Build once per graph."""
    if n_pad_rows is None or n_pad_cols is None:
        _, _, n_pad_rows, n_pad_cols = _choose_tiles(num_nodes)
    src, dst = edge_index[0], edge_index[1]
    loop = jnp.arange(num_nodes, dtype=edge_index.dtype)
    src = jnp.concatenate([src, loop])
    dst = jnp.concatenate([dst, loop])
    w = jnp.concatenate([edge_attr.astype(jnp.float32),
                         jnp.ones((num_nodes,), jnp.float32)])

    deg = jnp.zeros((num_nodes,), jnp.float32).at[dst].add(w)
    dinv = jnp.where(deg > 0, jax.lax.rsqrt(deg), 0.0)
    norm = dinv[src] * w * dinv[dst]

    a = jnp.zeros((n_pad_rows, n_pad_cols), jnp.float32).at[dst, src].add(norm)
    return a.astype(jnp.bfloat16)


def pack_gconv_lstm_params(weight, bias, input_channel, hidden_channel):
    """Pack torch-layout weight [4H, Cin+H] / bias [4H] into lane-dense,
    per-gate padded W^T [C_pad, 4*H_pad] (bf16) and bias [1, 4*H_pad] (f32),
    so each gate occupies its own 128-aligned lane block."""
    c_in = input_channel + hidden_channel
    c_pad = _round_up(c_in, 128)
    h_pad = _round_up(hidden_channel, 128)
    wt = jnp.zeros((c_pad, 4 * h_pad), jnp.float32)
    b = jnp.zeros((1, 4 * h_pad), jnp.float32)
    for gate in range(4):
        w_g = weight[gate * hidden_channel:(gate + 1) * hidden_channel, :]
        b_g = bias[gate * hidden_channel:(gate + 1) * hidden_channel]
        wt = wt.at[:c_in, gate * h_pad: gate * h_pad + hidden_channel].set(
            w_g.T.astype(jnp.float32))
        b = b.at[0, gate * h_pad: gate * h_pad + hidden_channel].set(
            b_g.astype(jnp.float32))
    return wt.astype(jnp.bfloat16), b


# ----------------------------------------------------------------------------
# Per-timestep cell (Pallas).  a_norm / wt_packed / bias_packed are reused
# across timesteps.
# ----------------------------------------------------------------------------
@jax.jit
def gconv_lstm_cell(x, h_t, c_t, a_norm, wt_packed, bias_packed):
    """Single GConvLSTM_cell step.  Returns (h_next, c_next), each [N, H]."""
    n = x.shape[0]
    cin = x.shape[1]
    hidden = h_t.shape[1]
    n_pad_rows, n_pad_cols = a_norm.shape
    c_pad, h4_pad = wt_packed.shape
    h_pad = h4_pad // 4
    tm = min(256, n_pad_rows)
    tk = min(512, n_pad_cols)

    # Lane/sublane zero-padded operands (padding keeps the math exact; padded
    # rows/lanes are stripped below).
    combined = jnp.zeros((n_pad_cols, c_pad), jnp.float32)
    combined = combined.at[:n, :cin].set(x.astype(jnp.float32))
    combined = combined.at[:n, cin:cin + hidden].set(h_t.astype(jnp.float32))
    combined = combined.astype(jnp.bfloat16)

    c_t_pad = jnp.zeros((n_pad_rows, h_pad), jnp.float32)
    c_t_pad = c_t_pad.at[:n, :hidden].set(c_t.astype(jnp.float32))

    grid = (n_pad_rows // tm, n_pad_cols // tk)

    h_next, c_next = pl.pallas_call(
        _gconv_lstm_kernel,
        out_shape=(jax.ShapeDtypeStruct((n_pad_rows, h_pad), jnp.float32),
                   jax.ShapeDtypeStruct((n_pad_rows, h_pad), jnp.float32)),
        grid_spec=pltpu.PrefetchScalarGridSpec(
            num_scalar_prefetch=0,
            grid=grid,
            in_specs=[
                pl.BlockSpec((tm, tk), lambda i, k: (i, k)),         # A tile
                pl.BlockSpec((tk, c_pad), lambda i, k: (k, 0)),      # [x,h] tile
                pl.BlockSpec((c_pad, h4_pad), lambda i, k: (0, 0)),  # W^T
                pl.BlockSpec((1, h4_pad), lambda i, k: (0, 0)),      # bias
                pl.BlockSpec((tm, h_pad), lambda i, k: (i, 0)),      # c_t
            ],
            out_specs=(
                pl.BlockSpec((tm, h_pad), lambda i, k: (i, 0)),      # h_next
                pl.BlockSpec((tm, h_pad), lambda i, k: (i, 0)),      # c_next
            ),
            scratch_shapes=[pltpu.VMEM((tm, c_pad), jnp.float32)],
        ),
        compiler_params=pltpu.CompilerParams(
            dimension_semantics=("parallel", "arbitrary"),
            vmem_limit_bytes=_vmem_limit_bytes(tm, tk, c_pad, h_pad),
        ),
        # Reuse the padded c_t HBM buffer for c_next (sequential LSTM loops).
        input_output_aliases={4: 1},
    )(a_norm, combined, wt_packed, bias_packed, c_t_pad)

    return h_next[:n, :hidden], c_next[:n, :hidden]


def gconv_lstm_forward(x, edge_index, edge_attr, h_t, c_t, weight, bias):
    """Convenience wrapper matching the PyTorch forward signature.
    For sequence loops, hoist gcn_norm_dense / pack_gconv_lstm_params."""
    n = x.shape[0]
    a_norm = gcn_norm_dense(edge_index, edge_attr, n)
    wt_p, b_p = pack_gconv_lstm_params(weight, bias, x.shape[1], h_t.shape[1])
    return gconv_lstm_cell(x, h_t, c_t, a_norm, wt_p, b_p)


# ----------------------------------------------------------------------------
# Pure-JAX f32 reference (mirrors the PyTorch module) for a sanity check.
# ----------------------------------------------------------------------------
def _reference_cell(x, edge_index, edge_attr, h_t, c_t, weight, bias):
    n = x.shape[0]
    hidden = h_t.shape[1]
    src, dst = edge_index[0], edge_index[1]
    loop = jnp.arange(n, dtype=edge_index.dtype)
    src = jnp.concatenate([src, loop])
    dst = jnp.concatenate([dst, loop])
    w = jnp.concatenate([edge_attr.astype(jnp.float32),
                         jnp.ones((n,), jnp.float32)])
    deg = jnp.zeros((n,), jnp.float32).at[dst].add(w)
    dinv = jnp.where(deg > 0, 1.0 / jnp.sqrt(deg), 0.0)
    norm = dinv[src] * w * dinv[dst]
    a = jnp.zeros((n, n), jnp.float32).at[dst, src].add(norm)

    combined = jnp.concatenate([x, h_t], axis=1)
    agg = a @ (combined @ weight.T) + bias
    cc_i = agg[:, 0 * hidden:1 * hidden]
    cc_f = agg[:, 1 * hidden:2 * hidden]
    cc_o = agg[:, 2 * hidden:3 * hidden]
    cc_g = agg[:, 3 * hidden:4 * hidden]
    i = jax.nn.sigmoid(cc_i)
    f = jax.nn.sigmoid(cc_f)
    o = jax.nn.sigmoid(cc_o)
    g = jnp.tanh(cc_g)
    c_next = f * c_t + i * g
    h_next = o * jnp.tanh(c_next)
    return h_next, c_next


# ----------------------------------------------------------------------------
# Deterministic parameter init (xavier_normal_ on lin.weight, zero bias).
# ----------------------------------------------------------------------------
def init_params(key, input_channel, hidden_channel):
    in_feat = input_channel + hidden_channel
    out_feat = 4 * hidden_channel
    std = (2.0 / (in_feat + out_feat)) ** 0.5
    weight = std * jax.random.normal(key, (out_feat, in_feat), jnp.float32)
    bias = jnp.zeros((out_feat,), jnp.float32)
    return weight, bias


if __name__ == "__main__":
    key = jax.random.PRNGKey(0)
    k_x, k_h, k_c, k_e, k_w, k_p = jax.random.split(key, 6)

    num_nodes = 16
    input_channel = 4
    hidden_channel = 8
    num_edges = 32
    num_steps = 3

    xs = jax.random.normal(k_x, (num_steps, num_nodes, input_channel),
                           jnp.float32)
    h0 = jax.random.normal(k_h, (num_nodes, hidden_channel), jnp.float32)
    c0 = jax.random.normal(k_c, (num_nodes, hidden_channel), jnp.float32)

    edge_index = jax.random.randint(k_e, (2, num_edges), 0, num_nodes,
                                    dtype=jnp.int32)
    edge_attr = jax.random.uniform(k_w, (num_edges,), jnp.float32,
                                   minval=0.1, maxval=1.0)

    weight, bias = init_params(k_p, input_channel, hidden_channel)

    # Hoisted once-per-graph precompute (reused every timestep).
    a_norm = gcn_norm_dense(edge_index, edge_attr, num_nodes)
    wt_p, bias_p = pack_gconv_lstm_params(weight, bias,
                                          input_channel, hidden_channel)

    # Short sequence: Pallas cell vs pure-JAX reference.
    h_k, c_k = h0, c0
    h_r, c_r = h0, c0
    for t in range(num_steps):
        h_k, c_k = gconv_lstm_cell(xs[t], h_k, c_k, a_norm, wt_p, bias_p)
        h_r, c_r = _reference_cell(xs[t], edge_index, edge_attr,
                                   h_r, c_r, weight, bias)
    jax.block_until_ready((h_k, c_k))

    assert h_k.shape == (num_nodes, hidden_channel)
    assert c_k.shape == (num_nodes, hidden_channel)
    assert bool(jnp.all(jnp.isfinite(h_k))) and bool(jnp.all(jnp.isfinite(c_k)))

    err_h = float(jnp.max(jnp.abs(h_k - h_r)))
    err_c = float(jnp.max(jnp.abs(c_k - c_r)))
    assert err_h < 5e-2 and err_c < 5e-2, (err_h, err_c)

    print("KERNEL_OK")
</pallas_src>

<mosaic_0001>
module attributes {stable_mosaic.version = 11 : i64} {
  func.func @_gconv_lstm_kernel(%arg0: i32, %arg1: i32, %arg2: memref<16x128xbf16, #tpu.memory_space<vmem>>, %arg3: memref<128x128xbf16, #tpu.memory_space<vmem>>, %arg4: memref<128x512xbf16, #tpu.memory_space<vmem>>, %arg5: memref<1x512xf32, #tpu.memory_space<vmem>>, %arg6: memref<16x128xf32, #tpu.memory_space<vmem>>, %arg7: memref<16x128xf32, #tpu.memory_space<vmem>>, %arg8: memref<16x128xf32, #tpu.memory_space<vmem>>, %arg9: memref<16x128xf32, #tpu.memory_space<vmem>>) attributes {dimension_semantics = [#tpu.dimension_semantics<parallel>, #tpu.dimension_semantics<arbitrary>], iteration_bounds = array<i64: 1, 1>, scalar_prefetch = 0 : i64, scratch_operands = 1 : i64, tpu.core_type = #tpu.core_type<tc>, window_params = [{transform_indices = @transform_0, window_bounds = array<i64: 16, 128>}, {transform_indices = @transform_1, window_bounds = array<i64: 128, 128>}, {pipeline_mode = #tpu.pipeline_mode<synchronous>, transform_indices = @transform_2, window_bounds = array<i64: 128, 512>}, {pipeline_mode = #tpu.pipeline_mode<synchronous>, transform_indices = @transform_3, window_bounds = array<i64: 1, 512>}, {transform_indices = @transform_4, window_bounds = array<i64: 16, 128>}, {transform_indices = @transform_5, window_bounds = array<i64: 16, 128>}, {transform_indices = @transform_6, window_bounds = array<i64: 16, 128>}]} {
    %c0_i32 = arith.constant 0 : i32
    %0 = arith.cmpi eq, %arg1, %c0_i32 : i32
    %1 = arith.extui %0 : i1 to i32
    %c0_i32_0 = arith.constant 0 : i32
    %2 = arith.cmpi ne, %1, %c0_i32_0 : i32
    scf.if %2 {
      %cst_10 = arith.constant 0.000000e+00 : f32
      %12 = vector.broadcast %cst_10 : f32 to vector<16x128xf32>
      %c0_11 = arith.constant 0 : index
      %c0_12 = arith.constant 0 : index
      %13 = vector.load %arg9[%c0_11, %c0_12] : memref<16x128xf32, #tpu.memory_space<vmem>>, vector<16x128xf32>
      tpu.vector_store %arg9[%c0_11, %c0_12], %12 {strides = array<i32>} : memref<16x128xf32, #tpu.memory_space<vmem>>, vector<16x128xf32>,
    } else {
    }
    %c0 = arith.constant 0 : index
    %c0_1 = arith.constant 0 : index
    %3 = vector.load %arg9[%c0, %c0_1] : memref<16x128xf32, #tpu.memory_space<vmem>>, vector<16x128xf32>
    %c0_2 = arith.constant 0 : index
    %c0_3 = arith.constant 0 : index
    %4 = vector.load %arg2[%c0_2, %c0_3] : memref<16x128xbf16, #tpu.memory_space<vmem>>, vector<16x128xbf16>
    %c0_4 = arith.constant 0 : index
    %c0_5 = arith.constant 0 : index
    %5 = vector.load %arg3[%c0_4, %c0_5] : memref<128x128xbf16, #tpu.memory_space<vmem>>, vector<128x128xbf16>
    %cst = arith.constant dense<0.000000e+00> : vector<16x128xf32>
    %6 = tpu.matmul %4, %5, %cst {dimension_numbers = #tpu.dot_dimension_numbers<[1], [0], [0], [1], [0, 0, 1, 1], [], []>} : vector<16x128xbf16>, vector<128x128xbf16>, vector<16x128xf32> -> vector<16x128xf32>
    %7 = arith.addf %3, %6 : vector<16x128xf32>
    %c0_6 = arith.constant 0 : index
    %c0_7 = arith.constant 0 : index
    %8 = vector.load %arg9[%c0_6, %c0_7] : memref<16x128xf32, #tpu.memory_space<vmem>>, vector<16x128xf32>
    tpu.vector_store %arg9[%c0_6, %c0_7], %7 {strides = array<i32>} : memref<16x128xf32, #tpu.memory_space<vmem>>, vector<16x128xf32>,
    %c0_i32_8 = arith.constant 0 : i32
    %9 = arith.cmpi eq, %arg1, %c0_i32_8 : i32
    %10 = arith.extui %9 : i1 to i32
    %c0_i32_9 = arith.constant 0 : i32
    %11 = arith.cmpi ne, %10, %c0_i32_9 : i32
    scf.if %11 {
      %c0_10 = arith.constant 0 : index
      %c0_11 = arith.constant 0 : index
      %12 = vector.load %arg9[%c0_10, %c0_11] : memref<16x128xf32, #tpu.memory_space<vmem>>, vector<16x128xf32>
      %13 = arith.truncf %12 : vector<16x128xf32> to vector<16x128xbf16>
      %c0_12 = arith.constant 0 : index
      %c0_13 = arith.constant 0 : index
      %14 = vector.load %arg4[%c0_12, %c0_13] : memref<128x512xbf16, #tpu.memory_space<vmem>>, vector<128x512xbf16>
      %cst_14 = arith.constant dense<0.000000e+00> : vector<16x512xf32>
      %15 = tpu.matmul %13, %14, %cst_14 {dimension_numbers = #tpu.dot_dimension_numbers<[1], [0], [0], [1], [0, 0, 1, 1], [], []>} : vector<16x128xbf16>, vector<128x512xbf16>, vector<16x512xf32> -> vector<16x512xf32>
      %c0_15 = arith.constant 0 : index
      %c0_16 = arith.constant 0 : index
      %16 = vector.load %arg5[%c0_15, %c0_16] : memref<1x512xf32, #tpu.memory_space<vmem>>, vector<1x512xf32>
      %17 = vector.broadcast %16 : vector<1x512xf32> to vector<16x512xf32>
      %18 = arith.addf %15, %17 : vector<16x512xf32>
      %19 = vector.extract_strided_slice %18 {offsets = [0, 0], sizes = [16, 384], strides = [1, 1]} : vector<16x512xf32> to vector<16x384xf32>
      %20 = arith.negf %19 : vector<16x384xf32>
      %21 = math.exp %20 : vector<16x384xf32>
      %cst_17 = arith.constant 1.000000e+00 : f32
      %22 = vector.broadcast %cst_17 : f32 to vector<16x384xf32>
      %23 = arith.addf %22, %21 : vector<16x384xf32>
      %24 = arith.divf %22, %23 : vector<16x384xf32>
      %25 = vector.extract_strided_slice %18 {offsets = [0, 384], sizes = [16, 128], strides = [1, 1]} : vector<16x512xf32> to vector<16x128xf32>
      %26 = math.tanh %25 : vector<16x128xf32>
      %27 = vector.extract_strided_slice %24 {offsets = [0, 0], sizes = [16, 128], strides = [1, 1]} : vector<16x384xf32> to vector<16x128xf32>
      %28 = vector.extract_strided_slice %24 {offsets = [0, 128], sizes = [16, 128], strides = [1, 1]} : vector<16x384xf32> to vector<16x128xf32>
      %29 = vector.extract_strided_slice %24 {offsets = [0, 256], sizes = [16, 128], strides = [1, 1]} : vector<16x384xf32> to vector<16x128xf32>
      %c0_18 = arith.constant 0 : index
      %c0_19 = arith.constant 0 : index
      %30 = vector.load %arg6[%c0_18, %c0_19] : memref<16x128xf32, #tpu.memory_space<vmem>>, vector<16x128xf32>
      %31 = arith.mulf %28, %30 : vector<16x128xf32>
      %32 = arith.mulf %27, %26 : vector<16x128xf32>
      %33 = arith.addf %31, %32 : vector<16x128xf32>
      %34 = math.tanh %33 : vector<16x128xf32>
      %35 = arith.mulf %29, %34 : vector<16x128xf32>
      %c0_20 = arith.constant 0 : index
      %c0_21 = arith.constant 0 : index
      %36 = vector.load %arg7[%c0_20, %c0_21] : memref<16x128xf32, #tpu.memory_space<vmem>>, vector<16x128xf32>
      tpu.vector_store %arg7[%c0_20, %c0_21], %35 {strides = array<i32>} : memref<16x128xf32, #tpu.memory_space<vmem>>, vector<16x128xf32>,
      %c0_22 = arith.constant 0 : index
      %c0_23 = arith.constant 0 : index
      %37 = vector.load %arg8[%c0_22, %c0_23] : memref<16x128xf32, #tpu.memory_space<vmem>>, vector<16x128xf32>
      tpu.vector_store %arg8[%c0_22, %c0_23], %33 {strides = array<i32>} : memref<16x128xf32, #tpu.memory_space<vmem>>, vector<16x128xf32>,
    } else {
    }
    return
  }
  func.func @transform_0(%arg0: i32, %arg1: i32) -> (i32, i32) {
    %c0_i32 = arith.constant 0 : i32
    return %arg0, %arg1 : i32, i32
  }
  func.func @transform_1(%arg0: i32, %arg1: i32) -> (i32, i32) {
    %c0_i32 = arith.constant 0 : i32
    %c0_i32_0 = arith.constant 0 : i32
    return %arg1, %c0_i32 : i32, i32
  }
  func.func @transform_2(%arg0: i32, %arg1: i32) -> (i32, i32) {
    %c0_i32 = arith.constant 0 : i32
    %c0_i32_0 = arith.constant 0 : i32
    %c0_i32_1 = arith.constant 0 : i32
    return %c0_i32, %c0_i32_0 : i32, i32
  }
  func.func @transform_3(%arg0: i32, %arg1: i32) -> (i32, i32) {
    %c0_i32 = arith.constant 0 : i32
    %c0_i32_0 = arith.constant 0 : i32
    %c0_i32_1 = arith.constant 0 : i32
    return %c0_i32, %c0_i32_0 : i32, i32
  }
  func.func @transform_4(%arg0: i32, %arg1: i32) -> (i32, i32) {
    %c0_i32 = arith.constant 0 : i32
    %c0_i32_0 = arith.constant 0 : i32
    return %arg0, %c0_i32 : i32, i32
  }
  func.func @transform_5(%arg0: i32, %arg1: i32) -> (i32, i32) {
    %c0_i32 = arith.constant 0 : i32
    %c0_i32_0 = arith.constant 0 : i32
    return %arg0, %c0_i32 : i32, i32
  }
  func.func @transform_6(%arg0: i32, %arg1: i32) -> (i32, i32) {
    %c0_i32 = arith.constant 0 : i32
    %c0_i32_0 = arith.constant 0 : i32
    return %arg0, %c0_i32 : i32, i32
  }
}

</mosaic_0001>

<bundles_post_ra>
// kernel: gconv_lstm_cell.1
= control target key start
LH: loop header
LB: loop body
LE: loop exit
PB: predicated region body
PF: predicated region fallthrough
CT: control target
= control target key end

     0   :  { %12 = vsyncpa [#allocation4], 0  ;;  %s722_s21 = smov [#allocation3]   ;;  %s914_s0 = inlined_call_operand.vmem [shape: bf16[16,128], index: 0, kind: input, shape index: {}]   ;;  %s915_s1 = inlined_call_operand.vmem [shape: bf16[128,128], index: 1, kind: input, shape index: {}]   ;;  %s916_s2 = inlined_call_operand.vmem [shape: bf16[128,512], index: 2, kind: input, shape index: {}]   ;;  %s917_s3 = inlined_call_operand.hbm [shape: f32[1,512], index: 3, kind: input, shape index: {}]   ;;  %s918_s4 = inlined_call_operand.vmem [shape: f32[16,128], index: 4, kind: input, shape index: {}, may-alias: {4,6}]   ;;  %s919_s5 = inlined_call_operand.vmem [shape: f32[16,128], index: 5, kind: output, shape index: {0}]   ;;  %s920_s6 = inlined_call_operand.vmem [shape: f32[16,128], index: 6, kind: output, shape index: {1}, may-alias: {4,6}]  }
   0x1   :  { %s25_s22 = sshll.u32 %s722_s21, 4  ;;  %s698_s25 = scalar_lea.hbm %s917_s3, 64  ;;  %s26_s22 = int_to_ptr.vmem [resolvable:$true] %s25_s22 }
   0x2   :  { %p699_p0 = scmp.ne.s32.totalorder %s917_s3, %s698_s25  ;;  %p702_p1 = scmp.lt.u32.totalorder %s698_s25, %s917_s3 }
   0x4   :  { %p704_p2 = pnand %p702_p1, %p699_p0 }
   0x6   :  { %707 = shalt.err (!%p704_p2)
}
   0x7   :  { %s708_s30 = scalar_lea.vmem %s26_s22, 64  ;;  %p713_p4 = scmp.lt.s32.totalorder %s26_s22, %s26_s22 }
   0x8   :  { %p709_p3 = scmp.ne.s32.totalorder %s26_s22, %s708_s30  ;;  %p714_p5 = scmp.lt.s32.totalorder %s708_s30, %s708_s30 }
   0xa   :  { %p715_p6 = por %p714_p5, %p713_p4 }
   0xc   :  { %p716_p7 = pnand %p715_p6, %p709_p3 }
   0xe   :  { %719 = shalt.err (!%p716_p7)
}
   0xf   :  { %28 = dma.hbm_to_vmem [thread:$0]  %s917_s3, 64, %s26_s22, [#allocation4]  }
  0x10   :  { %720 = dma.done.wait [#allocation4], 64  }
  0x11   :  { %721 = vsyncadd [#allocation4], 4294967232  ;;  %v723_v0 = vmov 0.0   ;;  %vm724_vm0 = vmmov 0   ;;  %v609_v1 = vld [vmem:[%s915_s1] sm:$0xff]   ;;  %v610_v2 = vld [vmem:[%s915_s1 + $0x8] sm:$0xff]   ;;  %v200_v48 = vlaneseq }
  0x12   :  { %585 = vmatprep.subr.bf16.mxu0 %v723_v0  ;;  %601 = vmatprep.mubr.msk.bf16.mxu0 %vm724_vm0, %v723_v0  ;;  %v611_v3 = vld [vmem:[%s915_s1 + $0x10] sm:$0xff]   ;;  %v612_v5 = vld [vmem:[%s915_s1 + $0x18] sm:$0xff]   ;;  %v613_v8 = vld [vmem:[%s915_s1 + $0x20] sm:$0xff]   ;;  %v725_v42 = vmov 0  }
  0x13   :  { %586 = vmatpush3.bf16.msra.mxu0 %v609_v1  ;;  %v618_v4 = vld [vmem:[%s916_s2 + $0x4] ss:$16 sps:$4 sm:$0xff]   ;;  %v623_v6 = vld [vmem:[%s916_s2] ss:$16 sps:$4 sm:$0xff]   ;;  %v614_v11 = vld [vmem:[%s915_s1 + $0x28] sm:$0xff]   ;;  %412 = vmatprep.mubr.bf16.mxu1 %v725_v42  ;;  %v201_v49 = vshrl.u32 %v200_v48, 7 }
  0x14   :  { %587 = vmatprep.subr.bf16.mxu0 %v723_v0  ;;  %380 = vmatprep.subr.bf16.mxu1 %v618_v4  ;;  %v624_v7 = vld [vmem:[%s916_s2 + $0x24] ss:$16 sps:$4 sm:$0xff]   ;;  %v629_v9 = vld [vmem:[%s916_s2 + $0x20] ss:$16 sps:$4 sm:$0xff]   ;;  %v616_v17 = vld [vmem:[%s915_s1 + $0x38] sm:$0xff]  }
  0x15   :  { %381 = vmatpush1.bf16.msra.mxu1 %v623_v6  ;;  %v630_v10 = vld [vmem:[%s916_s2 + $0x44] ss:$16 sps:$4 sm:$0xff]   ;;  %v635_v12 = vld [vmem:[%s916_s2 + $0x40] ss:$16 sps:$4 sm:$0xff]   ;;  %v622_v20 = vld [vmem:[%s916_s2 + $0xc] ss:$16 sps:$4 sm:$0xff]  }
  0x16   :  { %382 = vmatprep.subr.bf16.mxu1 %v624_v7  ;;  %v636_v13 = vld [vmem:[%s916_s2 + $0x64] ss:$16 sps:$4 sm:$0xff]   ;;  %v641_v15 = vld [vmem:[%s916_s2 + $0x60] ss:$16 sps:$4 sm:$0xff]   ;;  %v620_v23 = vld [vmem:[%s916_s2 + $0x8] ss:$16 sps:$4 sm:$0xff]  }
  0x17   :  { %588 = vmatpush3.bf16.msra.mxu0 %v610_v2  ;;  %v615_v14 = vld [vmem:[%s915_s1 + $0x30] sm:$0xff]   ;;  %v617_v21 = vld [vmem:[%s914_s0] sm:$0xff]   ;;  %v628_v25 = vld [vmem:[%s916_s2 + $0x2c] ss:$16 sps:$4 sm:$0xff]   ;;  %v202_v50 = vsub.s32 0, %v201_v49  ;;  %v206_v52 = vsub.s32 1, %v201_v49 }
  0x18   :  { %589 = vmatprep.subr.bf16.mxu0 %v723_v0  ;;  %v642_v16 = vld [vmem:[%s916_s2 + $0x84] ss:$16 sps:$4 sm:$0xff]   ;;  %v647_v18 = vld [vmem:[%s916_s2 + $0x80] ss:$16 sps:$4 sm:$0xff]   ;;  %v626_v27 = vld [vmem:[%s916_s2 + $0x28] ss:$16 sps:$4 sm:$0xff]  }
  0x19   :  { %383 = vmatpush1.bf16.msra.mxu1 %v629_v9  ;;  %v648_v19 = vld [vmem:[%s916_s2 + $0xa4] ss:$16 sps:$4 sm:$0xff]   ;;  %v653_v22 = vld [vmem:[%s916_s2 + $0xa0] ss:$16 sps:$4 sm:$0xff]   ;;  %v634_v28 = vld [vmem:[%s916_s2 + $0x4c] ss:$16 sps:$4 sm:$0xff]  }
  0x1a   :  { %384 = vmatprep.subr.bf16.mxu1 %v630_v10  ;;  %v654_v24 = vld [vmem:[%s916_s2 + $0xc4] ss:$16 sps:$4 sm:$0xff]   ;;  %v659_v26 = vld [vmem:[%s916_s2 + $0xc0] ss:$16 sps:$4 sm:$0xff]   ;;  %v632_v29 = vld [vmem:[%s916_s2 + $0x48] ss:$16 sps:$4 sm:$0xff]  }
  0x1b   :  { %590 = vmatpush3.bf16.msra.mxu0 %v611_v3  ;;  %v640_v30 = vld [vmem:[%s916_s2 + $0x6c] ss:$16 sps:$4 sm:$0xff]   ;;  %v638_v31 = vld [vmem:[%s916_s2 + $0x68] ss:$16 sps:$4 sm:$0xff]   ;;  %v660_v38 = vld [vmem:[%s916_s2 + $0xe4] ss:$16 sps:$4 sm:$0xff]  }
  0x1c   :  { %591 = vmatprep.subr.bf16.mxu0 %v723_v0  ;;  %v646_v32 = vld [vmem:[%s916_s2 + $0x8c] ss:$16 sps:$4 sm:$0xff]   ;;  %v644_v33 = vld [vmem:[%s916_s2 + $0x88] ss:$16 sps:$4 sm:$0xff]   ;;  %v665_v41 = vld [vmem:[%s916_s2 + $0xe0] ss:$16 sps:$4 sm:$0xff]  }
  0x1d   :  { %385 = vmatpush1.bf16.msra.mxu1 %v635_v12  ;;  %v652_v34 = vld [vmem:[%s916_s2 + $0xac] ss:$16 sps:$4 sm:$0xff]   ;;  %v650_v35 = vld [vmem:[%s916_s2 + $0xa8] ss:$16 sps:$4 sm:$0xff]   ;;  %v198_v51 = vld [vmem:[#allocation3] sm:$0xf] }
  0x1e   :  { %386 = vmatprep.subr.bf16.mxu1 %v636_v13  ;;  %v658_v36 = vld [vmem:[%s916_s2 + $0xcc] ss:$16 sps:$4 sm:$0xff]   ;;  %v656_v37 = vld [vmem:[%s916_s2 + $0xc8] ss:$16 sps:$4 sm:$0xff]   ;;  %v203_v53 = vrot.slane %v198_v51, %v202_v50  ;;  %v207_v54 = vrot.slane %v198_v51, %v206_v52  ;;  %v210_v56 = vsub.s32 2, %v201_v49  ;;  %v214_v1 = vsub.s32 3, %v201_v49 }
  0x1f   :  { %592 = vmatpush3.bf16.msra.mxu0 %v612_v5  ;;  %v664_v39 = vld [vmem:[%s916_s2 + $0xec] ss:$16 sps:$4 sm:$0xff]   ;;  %v662_v40 = vld [vmem:[%s916_s2 + $0xe8] ss:$16 sps:$4 sm:$0xff]  }
  0x20   :  { %593 = vmatprep.subr.bf16.mxu0 %v723_v0  ;;  %v211_v5 = vrot.slane %v198_v51, %v210_v56  ;;  %v215_v10 = vrot.slane %v198_v51, %v214_v1 }
  0x21   :  { %387 = vmatpush1.bf16.msra.mxu1 %v641_v15 }
  0x22   :  { %388 = vmatprep.subr.bf16.mxu1 %v642_v16 }
  0x23   :  { %594 = vmatpush3.bf16.msra.mxu0 %v613_v8 }
  0x24   :  { %595 = vmatprep.subr.bf16.mxu0 %v723_v0 }
  0x25   :  { %389 = vmatpush1.bf16.msra.mxu1 %v647_v18 }
  0x26   :  { %390 = vmatprep.subr.bf16.mxu1 %v648_v19 }
  0x27   :  { %596 = vmatpush3.bf16.msra.mxu0 %v614_v11 }
  0x28   :  { %597 = vmatprep.subr.bf16.mxu0 %v723_v0 }
  0x29   :  { %391 = vmatpush1.bf16.msra.mxu1 %v653_v22 }
  0x2a   :  { %392 = vmatprep.subr.bf16.mxu1 %v654_v24 }
  0x2b   :  { %598 = vmatpush3.bf16.msra.mxu0 %v615_v14 }
  0x2c   :  { %599 = vmatprep.subr.bf16.mxu0 %v723_v0 }
  0x2d   :  { %393 = vmatpush1.bf16.msra.mxu1 %v659_v26 }
  0x2e   :  { %394 = vmatprep.subr.bf16.mxu1 %v660_v38 }
  0x2f   :  { %600 = vmatpush3.bf16.msra.mxu0 %v616_v17 }
  0x30   :  { %423 = vmatprep.subr.bf16.mxu0 %v622_v20 }
  0x31   :  { %395 = vmatpush1.bf16.msra.mxu1 %v665_v41 }
  0x32   :  { %602 = vmatmul.mubr.bf16.vlgmr.msra.gmra.mrb[0].mxu0 %v617_v21 }
  0x33   :  { %424 = vmatpush1.bf16.msra.mxu0 %v620_v23  ;;  %455 = vmatprep.mubr.bf16.mxu0 %v725_v42 }
  0x34   :  { %425 = vmatprep.subr.bf16.mxu0 %v628_v25 }
  0x37   :  { %426 = vmatpush1.bf16.msra.mxu0 %v626_v27 }
  0x38   :  { %427 = vmatprep.subr.bf16.mxu0 %v634_v28 }
  0x3b   :  { %428 = vmatpush1.bf16.msra.mxu0 %v632_v29  ;;  %v504_v29 = vld [vmem:[%s918_s4] sm:$0xff] }
  0x3c   :  { %429 = vmatprep.subr.bf16.mxu0 %v640_v30 }
  0x3f   :  { %430 = vmatpush1.bf16.msra.mxu0 %v638_v31 }
  0x40   :  { %431 = vmatprep.subr.bf16.mxu0 %v646_v32 }
  0x43   :  { %432 = vmatpush1.bf16.msra.mxu0 %v644_v33 }
  0x44   :  { %433 = vmatprep.subr.bf16.mxu0 %v652_v34 }
  0x47   :  { %434 = vmatpush1.bf16.msra.mxu0 %v650_v35 }
  0x48   :  { %435 = vmatprep.subr.bf16.mxu0 %v658_v36  ;;  %v505_v36 = vld [vmem:[%s918_s4 + $0x8] sm:$0xff] }
  0x4b   :  { %436 = vmatpush1.bf16.msra.mxu0 %v656_v37 }
  0x4c   :  { %437 = vmatprep.subr.bf16.mxu0 %v664_v39 }
  0x4f   :  { %438 = vmatpush1.bf16.msra.mxu0 %v662_v40 }
 0x105   :  { %v149_v43 = vpop.f32.mrb[0].mxu0 }
 0x106   :  { %v603_v44 = vpop.f32.mrb[1].mxu0 }
 0x107   :  { %v152_v45 = vpop.f32.mrb[2].mxu0 }
 0x108   :  { %v165_v46 = vpack.c.bf16 %v152_v45, %v149_v43  ;;  %v604_v47 = vpop.f32.mrb[3].mxu0 }
 0x10a   :  { %413 = vmatmul.mubr.bf16.vlgmr.msra.gmra.mrb[0].mxu1 %v165_v46  ;;  %456 = vmatmul.mubr.bf16.vlgmr.msra.gmra.mrb[4].mxu0 %v165_v46 }
 0x1dd   :  { %v414_v55 = vpop.f32.mrb[0].mxu1  ;;  %v457_v57 = vpop.f32.mrb[4].mxu0 }
 0x1de   :  { %v415_v58 = vadd.f32 %v414_v55, %v203_v53  ;;  %v416_v59 = vpop.f32.mrb[1].mxu1  ;;  %v459_v60 = vpop.f32.mrb[5].mxu0  ;;  %v458_v11 = vadd.f32 %v457_v57, %v211_v5 }
 0x1df   :  { %v417_v61 = vadd.f32 %v416_v59, %v207_v54  ;;  %v418_v62 = vpop.f32.mrb[2].mxu1  ;;  %v461_v63 = vpop.f32.mrb[6].mxu0  ;;  %v460_v13 = vadd.f32 %v459_v60, %v215_v10 }
 0x1e0   :  { %v570_v0 = vmul.f32 -1.442695, %v415_v58  ;;  %v419_v2 = vadd.f32 %v418_v62, %v203_v53  ;;  %v420_v3 = vpop.f32.mrb[3].mxu1  ;;  %v463_v4 = vpop.f32.mrb[7].mxu0  ;;  %v462_v12 = vadd.f32 %v461_v63, %v211_v5  ;;  %v572_v14 = vmul.f32 -1.442695, %v458_v11 }
 0x1e1   :  { %v571_v6 = vmul.f32 -1.442695, %v417_v61  ;;  %v421_v7 = vadd.f32 %v420_v3, %v207_v54  ;;  %v464_v17 = vadd.f32 %v463_v4, %v215_v10 }
 0x1e2   :  { %666 = vpow2.f32 %v570_v0  ;;  %v573_v8 = vmul.f32 -1.442695, %v419_v2  ;;  %v575_v15 = vmul.f32 -1.442695, %v462_v12 }
 0x1e3   :  { %v574_v9 = vmul.f32 -1.442695, %v421_v7  ;;  %668 = vpow2.f32 %v571_v6 }
 0x1e4   :  { %670 = vpow2.f32 %v573_v8 }
 0x1e5   :  { %672 = vpow2.f32 %v574_v9 }
 0x1e6   :  { %674 = vtanh.f32 %v460_v13 }
 0x1e7   :  { %676 = vpow2.f32 %v572_v14 }
 0x1e8   :  { %678 = vpow2.f32 %v575_v15 }
 0x1ec   :  { %v667_v16 = vpop.eup %666 }
 0x1ed   :  { %v484_v18 = vadd.f32 1.0, %v667_v16  ;;  %v669_v19 = vpop.eup %668 }
 0x1ee   :  { %v671_v20 = vpop.eup %670  ;;  %v485_v21 = vadd.f32 1.0, %v669_v19 }
 0x1ef   :  { %680 = vrcp.f32 %v484_v18  ;;  %v487_v22 = vadd.f32 1.0, %v671_v20  ;;  %v673_v23 = vpop.eup %672 }
 0x1f0   :  { %682 = vtanh.f32 %v464_v17  ;;  %v488_v24 = vadd.f32 1.0, %v673_v23  ;;  %v675_v25 = vpop.eup %674 }
 0x1f1   :  { %684 = vrcp.f32 %v485_v21  ;;  %v677_v26 = vpop.eup %676 }
 0x1f2   :  { %686 = vrcp.f32 %v487_v22  ;;  %v679_v27 = vpop.eup %678  ;;  %v486_v33 = vadd.f32 1.0, %v677_v26 }
 0x1f3   :  { %688 = vrcp.f32 %v488_v24  ;;  %v489_v40 = vadd.f32 1.0, %v679_v27 }
 0x1f4   :  { %690 = vrcp.f32 %v486_v33 }
 0x1f9   :  { %v681_v28 = vpop.eup %680 }
 0x1fa   :  { %v683_v30 = vpop.eup %682  ;;  %v508_v31 = vmul.f32 %v681_v28, %v675_v25 }
 0x1fb   :  { %v685_v32 = vpop.eup %684 }
 0x1fc   :  { %v687_v34 = vpop.eup %686  ;;  %v506_v35 = vmul.f32 %v685_v32, %v504_v29 }
 0x1fd   :  { %v509_v37 = vmul.f32 %v687_v34, %v683_v30  ;;  %v689_v38 = vpop.eup %688 }
 0x1fe   :  { %v510_v39 = vadd.f32 %v508_v31, %v506_v35  ;;  %v507_v41 = vmul.f32 %v689_v38, %v505_v36  ;;  %v691_v43 = vpop.eup %690 }
 0x200   :  { %692 = vtanh.f32 %v510_v39  ;;  %518 = vst [vmem:[%s920_s6] sm:$0xff] %v510_v39  ;;  %v511_v42 = vadd.f32 %v509_v37, %v507_v41 }
 0x201   :  { %694 = vrcp.f32 %v489_v40 }
 0x202   :  { %696 = vtanh.f32 %v511_v42  ;;  %519 = vst [vmem:[%s920_s6 + $0x8] sm:$0xff] %v511_v42 }
 0x20a   :  { %v693_v44 = vpop.eup %692 }
 0x20b   :  { %v514_v45 = vmul.f32 %v693_v44, %v691_v43  ;;  %v695_v46 = vpop.eup %694 }
 0x20c   :  { %v697_v47 = vpop.eup %696 }
 0x20d   :  { %516 = vst [vmem:[%s919_s5] sm:$0xff] %v514_v45  ;;  %v515_v48 = vmul.f32 %v697_v47, %v695_v46 }
 0x20f   :  { %517 = vst [vmem:[%s919_s5 + $0x8] sm:$0xff] %v515_v48 }
 0x210   :  { %528 = vsyncpa [#allocation4], 1 }

</bundles_post_ra>
